<compile_context>
chip_gen: v7x
topology: tpu7x:2x2x1
jax: 0.10.0
libtpu: 0.0.40
codegen_flags: <defaults>
</compile_context>

<pallas_src>
import functools

import jax
import jax.numpy as jnp
from jax.experimental import pallas as pl
from jax.experimental.pallas import tpu as pltpu


def _snake_kernel(x_ref, o_ref, *, alpha, inv_alpha):
    # x_ref / o_ref: (block_rows, W) tiles in VMEM, original dtype.
    x = x_ref[...].astype(jnp.float32)
    s = jnp.sin(alpha * x)
    o_ref[...] = (x + inv_alpha * (s * s)).astype(o_ref.dtype)


def snake(x, alpha=0.5):
    """Snake activation via a Pallas TPU kernel. x: any shape, float dtype."""
    orig_shape = x.shape
    dtype = x.dtype
    n = x.size
    if n == 0:
        return x

    # Pick a lane-dense slab width that divides n exactly so the reshape is a
    # free metadata op (no padded HBM copy, no trailing slice pass).
    W = None
    for w in (4096, 2048, 1024, 512, 256, 128):
        if n % w == 0:
            W = w
            break

    padded = False
    if W is None:
        # Rare fallback: element count not a multiple of 128 lanes.
        W = 128
        n_pad = ((n + W - 1) // W) * W
        xf = jnp.pad(jnp.ravel(x), (0, n_pad - n))
        rows = n_pad // W
        padded = True
    else:
        xf = jnp.ravel(x)
        rows = n // W
    x2d = xf.reshape(rows, W)

    # Block sizing: ~2 MiB per buffer. One input + one output, each
    # double-buffered -> ~8 MiB of pipelined VMEM.
    itemsize = jnp.dtype(dtype).itemsize
    sub = max(8, 32 // max(itemsize, 1))           # sublane tile for this dtype
    target_bytes = 2 * 1024 * 1024
    br = max(sub, target_bytes // (W * itemsize))
    br = (br // sub) * sub                         # keep (8,128)-legal tiles
    if br >= rows:
        br = rows                                  # full extent: always legal
    grid = (pl.cdiv(rows, br),)

    kernel = functools.partial(
        _snake_kernel,
        alpha=float(alpha),
        inv_alpha=float(1.0 / alpha),
    )

    out2d = pl.pallas_call(
        kernel,
        out_shape=jax.ShapeDtypeStruct((rows, W), dtype),
        grid_spec=pltpu.PrefetchScalarGridSpec(
            num_scalar_prefetch=0,
            grid=grid,
            in_specs=[pl.BlockSpec((br, W), lambda i: (i, 0))],
            out_specs=pl.BlockSpec((br, W), lambda i: (i, 0)),
        ),
        compiler_params=pltpu.CompilerParams(
            dimension_semantics=("parallel",),
        ),
    )(x2d)

    out = out2d.reshape(-1)
    if padded:
        out = out[:n]
    return out.reshape(orig_shape)


if __name__ == "__main__":
    key = jax.random.PRNGKey(0)
    # NCHW-style input, consistent with a conv-net activation use.
    x = jax.random.normal(key, (2, 4, 16, 16), dtype=jnp.float32)

    alpha = 0.5
    y = snake(x, alpha=alpha)
    y = jax.block_until_ready(y)

    # Reference check (plain JAX, same math as the PyTorch module).
    y_ref = x + (1.0 / alpha) * jnp.sin(alpha * x) ** 2
    assert y.shape == x.shape and y.dtype == x.dtype
    assert jnp.allclose(y, y_ref, atol=1e-5, rtol=1e-5)

    print("KERNEL_OK")
</pallas_src>

<mosaic_0001>
module attributes {stable_mosaic.version = 11 : i64} {
  func.func @_snake_kernel(%arg0: i32, %arg1: memref<1x2048xf32, #tpu.memory_space<vmem>>, %arg2: memref<1x2048xf32, #tpu.memory_space<vmem>>) attributes {dimension_semantics = [#tpu.dimension_semantics<parallel>], iteration_bounds = array<i64: 1>, scalar_prefetch = 0 : i64, scratch_operands = 0 : i64, tpu.core_type = #tpu.core_type<tc>, window_params = [{transform_indices = @transform_0, window_bounds = array<i64: 1, 2048>}, {transform_indices = @transform_1, window_bounds = array<i64: 1, 2048>}]} {
    %c0 = arith.constant 0 : index
    %c0_0 = arith.constant 0 : index
    %0 = vector.load %arg1[%c0, %c0_0] : memref<1x2048xf32, #tpu.memory_space<vmem>>, vector<1x2048xf32>
    %cst = arith.constant 5.000000e-01 : f32
    %1 = vector.broadcast %cst : f32 to vector<1x2048xf32>
    %2 = arith.mulf %1, %0 : vector<1x2048xf32>
    %3 = math.sin %2 : vector<1x2048xf32>
    %4 = arith.mulf %3, %3 : vector<1x2048xf32>
    %cst_1 = arith.constant 2.000000e+00 : f32
    %5 = vector.broadcast %cst_1 : f32 to vector<1x2048xf32>
    %6 = arith.mulf %5, %4 : vector<1x2048xf32>
    %7 = arith.addf %0, %6 : vector<1x2048xf32>
    %c0_2 = arith.constant 0 : index
    %c0_3 = arith.constant 0 : index
    %8 = vector.load %arg2[%c0_2, %c0_3] : memref<1x2048xf32, #tpu.memory_space<vmem>>, vector<1x2048xf32>
    tpu.vector_store %arg2[%c0_2, %c0_3], %7 {strides = array<i32>} : memref<1x2048xf32, #tpu.memory_space<vmem>>, vector<1x2048xf32>,
    return
  }
  func.func @transform_0(%arg0: i32) -> (i32, i32) {
    %c0_i32 = arith.constant 0 : i32
    %c0_i32_0 = arith.constant 0 : i32
    return %arg0, %c0_i32 : i32, i32
  }
  func.func @transform_1(%arg0: i32) -> (i32, i32) {
    %c0_i32 = arith.constant 0 : i32
    %c0_i32_0 = arith.constant 0 : i32
    return %arg0, %c0_i32 : i32, i32
  }
}

</mosaic_0001>

<bundles_post_ra>
// kernel: tpu_custom_call.1
= control target key start
LH: loop header
LB: loop body
LE: loop exit
PB: predicated region body
PF: predicated region fallthrough
CT: control target
= control target key end

     0   :  { %6 = vsyncpa [#allocation3], 0  ;;  %s456_s0 = inlined_call_operand.hbm [shape: f32[1,2048], index: 0, kind: input, shape index: {}]   ;;  %s457_s1 = inlined_call_operand.hbm [shape: f32[1,2048], index: 1, kind: output, shape index: {}]  }
   0x1   :  { %7 = vsyncpa [#allocation4], 0  ;;  %s336_s6 = smov [#allocation2]   ;;  %s288_s10 = scalar_lea.hbm %s456_s0, 256 }
   0x2   :  { %s14_s7 = sshll.u32 %s336_s6, 4  ;;  %p289_p0 = scmp.ne.s32.totalorder %s456_s0, %s288_s10  ;;  %s15_s7 = int_to_ptr.vmem [resolvable:$true] %s14_s7 }
   0x3   :  { %p292_p1 = scmp.lt.u32.totalorder %s288_s10, %s456_s0 }
   0x5   :  { %p294_p2 = pnand %p292_p1, %p289_p0 }
   0x7   :  { %297 = shalt.err (!%p294_p2)
}
   0x8   :  { %s298_s15 = scalar_lea.vmem %s15_s7, 256  ;;  %p303_p4 = scmp.lt.s32.totalorder %s15_s7, %s15_s7 }
   0x9   :  { %p299_p3 = scmp.ne.s32.totalorder %s15_s7, %s298_s15  ;;  %p304_p5 = scmp.lt.s32.totalorder %s298_s15, %s298_s15 }
   0xb   :  { %p305_p6 = por %p304_p5, %p303_p4 }
   0xd   :  { %p306_p7 = pnand %p305_p6, %p299_p3 }
   0xf   :  { %309 = shalt.err (!%p306_p7)
}
  0x10   :  { %17 = dma.hbm_to_vmem [thread:$0]  %s456_s0, 256, %s15_s7, [#allocation3]  }
  0x11   :  { %332 = dma.done.wait [#allocation3], 256  }
  0x12   :  { %333 = vsyncadd [#allocation3], 4294967040  ;;  %v366_v0 = vld [vmem:[#allocation2] sm:$0xff]  ;;  %v368_v1 = vld [vmem:[#allocation2 + $0x8] sm:$0xff]  ;;  %v337_v26 = vmov 683565275  }
  0x13   :  { %v371_v2 = vmul.f32 0.5, %v366_v0  ;;  %v374_v3 = vmul.f32 0.5, %v368_v1  ;;  %v338_v28 = vmov 2475754826   ;;  %v339_v30 = vmov 2131351028  }
  0x14   :  { %v340_v32 = vmov 2102212464   ;;  %v341_v34 = vmov 920167782   ;;  %v342_v42 = vmov 1326507024  }
  0x15   :  { %v25_v4 = vand.u32 2147483647, %v371_v2  ;;  %v28_v5 = vand.u32 2139095040, %v371_v2  ;;  %v129_v6 = vand.u32 2147483647, %v374_v3  ;;  %v132_v7 = vand.u32 2139095040, %v374_v3 }
  0x16   :  { %vm27_vm14 = vcmp.lt.s32.totalorder %v371_v2, 0  ;;  %s343_s0 = smov [#allocation5]  }
  0x17   :  { %v29_v8 = vshrl.u32 %v28_v5, 23  ;;  %v32_v9 = vand.u32 8388607, %v25_v4  ;;  %v133_v10 = vshrl.u32 %v132_v7, 23  ;;  %v136_v11 = vand.u32 8388607, %v129_v6 }
  0x18   :  { %vm26_vm15 = vcmp.le.f32.partialorder %v25_v4, 0.7853982  ;;  %s247_s18 = sshll.u32 %s343_s0, 4  ;;  %s248_s18 = int_to_ptr.vmem [resolvable:$true] %s247_s18 }
  0x19   :  { %v256_v12 = vadd.s32 4294967169, %v29_v8  ;;  %v260_v13 = vadd.s32 4294967169, %v133_v10  ;;  %v33_v15 = vor.u32 8388608, %v32_v9  ;;  %v137_v16 = vor.u32 8388608, %v136_v11  ;;  %s310_s19 = scalar_lea.vmem %s248_s18, 256  ;;  %p315_p9 = scmp.lt.s32.totalorder %s248_s18, %s248_s18 }
  0x1a   :  { %p311_p8 = scmp.ne.s32.totalorder %s248_s18, %s310_s19  ;;  %p316_p10 = scmp.lt.s32.totalorder %s310_s19, %s310_s19 }
  0x1b   :  { %v35_v14 = vadd.s32 1, %v256_v12  ;;  %v139_v17 = vadd.s32 1, %v260_v13  ;;  %v384_v22 = vshll.u32 %v33_v15, 8  ;;  %v386_v24 = vshll.u32 %v137_v16, 8 }
  0x1c   :  { %p317_p11 = por %p316_p10, %p315_p9 }
  0x1d   :  { %vm36_vm0 = vcmp.gt.s32.totalorder %v35_v14, 0  ;;  %vm140_vm1 = vcmp.gt.s32.totalorder %v139_v17, 0 }
  0x1e   :  { %v37_v18 = vsel %vm36_vm0, %v35_v14, 0  ;;  %v141_v21 = vsel %vm140_vm1, %v139_v17, 0  ;;  %vm131_vm0 = vcmp.lt.s32.totalorder %v374_v3, 0  ;;  %vm130_vm1 = vcmp.le.f32.partialorder %v129_v6, 0.7853982  ;;  %p318_p12 = pnand %p317_p11, %p311_p8 }
  0x1f   :  { %v38_v19 = vshrl.u32 %v37_v18, 5  ;;  %v39_v20 = vand.u32 31, %v37_v18  ;;  %v143_v23 = vand.u32 31, %v141_v21  ;;  %v388_v36 = vshrl.u32 %v141_v21, 5 }
  0x21   :  { %v40_v25 = vsub.s32 32, %v39_v20  ;;  %v42_v27 = vshll.u32 %v337_v26, %v39_v20  ;;  %v45_v29 = vshll.u32 %v338_v28, %v39_v20  ;;  %v48_v31 = vshll.u32 %v339_v30, %v39_v20 }
  0x22   :  { %v51_v33 = vshll.u32 %v340_v32, %v39_v20  ;;  %v54_v35 = vshll.u32 %v341_v34, %v39_v20  ;;  %vm57_vm2 = vcmp.lt.s32.totalorder %v38_v19, 1  ;;  %vm58_vm3 = vcmp.lt.s32.totalorder %v38_v19, 2 }
  0x23   :  { %v41_v37 = vshrl.u32 %v337_v26, %v40_v25  ;;  %v43_v38 = vshrl.u32 %v338_v28, %v40_v25  ;;  %v46_v39 = vshrl.u32 %v339_v30, %v40_v25  ;;  %v49_v40 = vshrl.u32 %v340_v32, %v40_v25 }
  0x24   :  { %v52_v41 = vshrl.u32 %v341_v34, %v40_v25  ;;  %v55_v43 = vshrl.u32 %v342_v42, %v40_v25  ;;  %vm60_vm4 = vcmp.lt.s32.totalorder %v38_v19, 4  ;;  %v144_v47 = vsub.s32 32, %v143_v23 }
  0x25   :  { %v44_v44 = vor.u32 %v43_v38, %v42_v27  ;;  %v47_v45 = vor.u32 %v46_v39, %v45_v29  ;;  %v50_v46 = vor.u32 %v49_v40, %v48_v31  ;;  %vm59_vm5 = vcmp.lt.s32.totalorder %v38_v19, 3 }
  0x26   :  { %v53_v48 = vor.u32 %v52_v41, %v51_v33  ;;  %v56_v49 = vor.u32 %v55_v43, %v54_v35  ;;  %v146_v50 = vshll.u32 %v337_v26, %v143_v23  ;;  %v149_v58 = vshll.u32 %v338_v28, %v143_v23 }
  0x27   :  { %v61_v51 = vsel %vm57_vm2, %v41_v37, %v44_v44  ;;  %v62_v52 = vsel %vm60_vm4, %v50_v46, 2102212464  ;;  %v65_v53 = vsel %vm57_vm2, %v44_v44, %v47_v45  ;;  %v69_v54 = vsel %vm57_vm2, %v47_v45, %v50_v46 }
  0x28   :  { %v63_v55 = vsel %vm59_vm5, %v47_v45, %v62_v52  ;;  %v66_v56 = vsel %vm60_vm4, %v53_v48, 920167782  ;;  %v70_v57 = vsel %vm60_vm4, %v56_v49, 1326507024  ;;  %v145_v61 = vshrl.u32 %v337_v26, %v144_v47 }
  0x29   :  { %v67_v59 = vsel %vm59_vm5, %v50_v46, %v66_v56  ;;  %v71_v60 = vsel %vm59_vm5, %v53_v48, %v70_v57  ;;  %v147_v62 = vshrl.u32 %v338_v28, %v144_v47  ;;  %v64_v63 = vsel %vm58_vm3, %v61_v51, %v63_v55 }
  0x2a   :  { %v68_v5 = vsel %vm58_vm3, %v65_v53, %v67_v59  ;;  %v72_v7 = vsel %vm58_vm3, %v69_v54, %v71_v60  ;;  %v150_v8 = vshrl.u32 %v339_v30, %v144_v47  ;;  %v152_v15 = vshll.u32 %v339_v30, %v143_v23 }
  0x2b   :  { %v397_v9 = vmul.u32.u64.low %v384_v22, %v72_v7  ;;  %v398_v10 = vmul.u32.u64.high %v384_v22, %v72_v7, %v397_v9  ;;  %v401_v11 = vmul.u32.u64.low %v384_v22, %v68_v5  ;;  %v402_v12 = vmul.u32.u64.high %v384_v22, %v68_v5, %v401_v11 }
  0x2c   :  { %v148_v13 = vor.u32 %v147_v62, %v146_v50  ;;  %v151_v14 = vor.u32 %v150_v8, %v149_v58  ;;  %v153_v16 = vshrl.u32 %v340_v32, %v144_v47  ;;  %v155_v17 = vshll.u32 %v340_v32, %v143_v23 }
  0x2d   :  { %v156_v18 = vshrl.u32 %v341_v34, %v144_v47  ;;  %v158_v20 = vshll.u32 %v341_v34, %v143_v23  ;;  %v159_v21 = vshrl.u32 %v342_v42, %v144_v47  ;;  %v80_v19 = vmul.u32 %v384_v22, %v64_v63 }
  0x2e   :  { %v154_v25 = vor.u32 %v153_v16, %v152_v15  ;;  %vm161_vm6 = vcmp.lt.s32.totalorder %v388_v36, 1  ;;  %vm162_vm7 = vcmp.lt.s32.totalorder %v388_v36, 2  ;;  %vm82_vm8 = vc.u32 %v398_v10, %v401_v11 }
  0x2f   :  { %v83_v26 = vadd.s32 1, %v402_v12  ;;  %v157_v27 = vor.u32 %v156_v18, %v155_v17  ;;  %vm163_vm9 = vcmp.lt.s32.totalorder %v388_v36, 3  ;;  %v160_v28 = vor.u32 %v159_v21, %v158_v20 }
  0x30   :  { %vm164_vm10 = vcmp.lt.s32.totalorder %v388_v36, 4  ;;  %v165_v29 = vsel %vm161_vm6, %v145_v61, %v148_v13  ;;  %v169_v23 = vsel %vm161_vm6, %v148_v13, %v151_v14  ;;  %v173_v32 = vsel %vm161_vm6, %v151_v14, %v154_v25 }
  0x31   :  { %v84_v30 = vsel %vm82_vm8, %v83_v26, %v402_v12  ;;  %v166_v22 = vsel %vm164_vm10, %v154_v25, 2102212464  ;;  %v170_v31 = vsel %vm164_vm10, %v157_v27, 920167782  ;;  %v174_v37 = vsel %vm164_vm10, %v160_v28, 1326507024 }
  0x32   :  { %v85_v33 = vadd.s32 %v84_v30, %v80_v19  ;;  %v167_v34 = vsel %vm163_vm9, %v151_v14, %v166_v22  ;;  %v171_v35 = vsel %vm163_vm9, %v154_v25, %v170_v31  ;;  %v175_v40 = vsel %vm163_vm9, %v157_v27, %v174_v37 }
  0x33   :  { %v168_v38 = vsel %vm162_vm7, %v165_v29, %v167_v34  ;;  %v172_v39 = vsel %vm162_vm7, %v169_v23, %v171_v35  ;;  %v176_v42 = vsel %vm162_vm7, %v173_v32, %v175_v40  ;;  %v81_v61 = vadd.s32 %v401_v11, %v398_v10 }
  0x34   :  { %v86_v41 = vadd.s32 536870912, %v85_v33  ;;  %v419_v43 = vmul.u32.u64.low %v386_v24, %v172_v39  ;;  %v420_v44 = vmul.u32.u64.high %v386_v24, %v172_v39, %v419_v43  ;;  %v184_v48 = vmul.u32 %v386_v24, %v168_v38 }
  0x35   :  { %v423_v45 = vmul.u32.u64.low %v386_v24, %v176_v42  ;;  %v424_v46 = vmul.u32.u64.high %v386_v24, %v176_v42, %v423_v45  ;;  %vm117_vm5 = vweird.f32 %v371_v2  ;;  %vm221_vm9 = vweird.f32 %v374_v3 }
  0x36   :  { %v87_v47 = vshrl.u32 %v86_v41, 30  ;;  %v187_v50 = vadd.s32 1, %v420_v44 }
  0x37   :  { %vm186_vm11 = vc.u32 %v424_v46, %v419_v43  ;;  %v185_v20 = vadd.s32 %v419_v43, %v424_v46 }
  0x38   :  { %v88_v49 = vshll.u32 %v87_v47, 30  ;;  %v188_v36 = vsel %vm186_vm11, %v187_v50, %v420_v44  ;;  %v111_v10 = vsub.s32 4, %v87_v47 }
  0x39   :  { %v189_v52 = vadd.s32 %v188_v36, %v184_v48 }
  0x3a   :  { %v89_v51 = vsub.s32 %v85_v33, %v88_v49  ;;  %v112_v30 = vsel %vm27_vm14, %v111_v10, %v87_v47 }
  0x3b   :  { %v190_v54 = vadd.s32 536870912, %v189_v52  ;;  %v114_v34 = vsel %vm26_vm15, 0, %v112_v30 }
  0x3c   :  { %v91_v53 = vsub.s32 0, %v89_v51  ;;  %v118_v40 = vadd.s32 3, %v114_v34 }
  0x3d   :  { %v191_v56 = vshrl.u32 %v190_v54, 30 }
  0x3e   :  { %v257_v55 = vmin.u32 %v91_v53, %v89_v51  ;;  %v119_v43 = vand.u32 3, %v118_v40 }
  0x3f   :  { %v192_v58 = vshll.u32 %v191_v56, 30  ;;  %v215_v39 = vsub.s32 4, %v191_v56 }
  0x40   :  { %v93_v57 = vclz %v257_v55  ;;  %vm124_vm2 = vcmp.eq.s32.totalorder %v119_v43, 2  ;;  %vm121_vm3 = vcmp.eq.s32.totalorder %v119_v43, 0  ;;  %vm120_vm4 = vcmp.lt.s32.totalorder %v119_v43, 2 }
  0x41   :  { %v193_v60 = vsub.s32 %v189_v52, %v192_v58  ;;  %v216_v42 = vsel %vm131_vm0, %v215_v39, %v191_v56 }
  0x42   :  { %v258_v59 = vadd.s32 4294967294, %v93_v57  ;;  %v218_v46 = vsel %vm130_vm1, 0, %v216_v42 }
  0x43   :  { %v195_v62 = vsub.s32 0, %v193_v60  ;;  %v222_v50 = vadd.s32 3, %v218_v46 }
  0x44   :  { %vm259_vm12 = vcmp.lt.s32.totalorder %v258_v59, 0 }
  0x45   :  { %v96_v24 = vsel %vm259_vm12, 0, %v258_v59  ;;  %v261_v8 = vmin.u32 %v195_v62, %v193_v60  ;;  %v223_v53 = vand.u32 3, %v222_v50 }
  0x46   :  { %v97_v63 = vsub.s32 32, %v96_v24  ;;  %v98_v5 = vshll.u32 %v89_v51, %v96_v24  ;;  %v101_v7 = vsub.s32 4294967266, %v96_v24 }
  0x47   :  { %v197_v13 = vclz %v261_v8  ;;  %vm228_vm6 = vcmp.eq.s32.totalorder %v223_v53, 2  ;;  %vm225_vm7 = vcmp.eq.s32.totalorder %v223_v53, 0  ;;  %vm224_vm8 = vcmp.lt.s32.totalorder %v223_v53, 2 }
  0x48   :  { %v99_v9 = vshrl.u32 %v81_v61, %v97_v63  ;;  %v102_v12 = vadd.s32 127, %v101_v7 }
  0x49   :  { %v262_v16 = vadd.s32 4294967294, %v197_v13 }
  0x4a   :  { %v100_v14 = vor.u32 %v99_v9, %v98_v5  ;;  %v103_v15 = vshll.u32 %v102_v12, 23 }
  0x4b   :  { %vm263_vm13 = vcmp.lt.s32.totalorder %v262_v16, 0 }
  0x4c   :  { %v104_v17 = vor.u32 4788187, %v103_v15  ;;  %v107_v18 = vcvt.s32.f32 %v100_v14  ;;  %v200_v11 = vsel %vm263_vm13, 0, %v262_v16 }
  0x4d   :  { %v201_v19 = vsub.s32 32, %v200_v11  ;;  %v202_v25 = vshll.u32 %v193_v60, %v200_v11  ;;  %v205_v26 = vsub.s32 4294967266, %v200_v11 }
  0x4e   :  { %v105_v21 = vand.u32 2147483647, %v104_v17 }
  0x4f   :  { %v203_v28 = vshrl.u32 %v185_v20, %v201_v19  ;;  %v206_v29 = vadd.s32 127, %v205_v26 }
  0x50   :  { %v108_v27 = vmul.f32 %v107_v18, %v105_v21 }
  0x51   :  { %v204_v22 = vor.u32 %v203_v28, %v202_v25  ;;  %v207_v31 = vshll.u32 %v206_v29, 23 }
  0x52   :  { %v109_v23 = vxor.u32 2147483648, %v108_v27 }
  0x53   :  { %v208_v35 = vor.u32 4788187, %v207_v31  ;;  %v211_v37 = vcvt.s32.f32 %v204_v22 }
  0x54   :  { %v110_v32 = vsel %vm27_vm14, %v109_v23, %v108_v27 }
  0x55   :  { %v113_v33 = vsel %vm26_vm15, %v371_v2, %v110_v32  ;;  %v209_v38 = vand.u32 2147483647, %v208_v35 }
  0x56   :  { %280 = vcosq.f32 %v113_v33 }
  0x57   :  { %282 = vsinq.f32 %v113_v33  ;;  %v212_v41 = vmul.f32 %v211_v37, %v209_v38 }
  0x59   :  { %v213_v4 = vxor.u32 2147483648, %v212_v41 }
  0x5b   :  { %v214_v44 = vsel %vm131_vm0, %v213_v4, %v212_v41 }
  0x5c   :  { %v217_v45 = vsel %vm130_vm1, %v374_v3, %v214_v44 }
  0x5d   :  { %284 = vcosq.f32 %v217_v45 }
  0x5e   :  { %286 = vsinq.f32 %v217_v45 }
  0x60   :  { %v281_v47 = vpop.eup %280 }
  0x61   :  { %v283_v48 = vpop.eup %282  ;;  %v125_v49 = vxor.u32 2147483648, %v281_v47 }
  0x62   :  { %v122_v51 = vxor.u32 2147483648, %v283_v48 }
  0x63   :  { %v126_v6 = vsel %vm124_vm2, %v125_v49, %v283_v48 }
  0x64   :  { %v123_v36 = vsel %vm121_vm3, %v281_v47, %v122_v51 }
  0x65   :  { %v127_v52 = vsel %vm120_vm4, %v123_v36, %v126_v6 }
  0x66   :  { %v128_v54 = vsel %vm117_vm5, nan, %v127_v52 }
  0x67   :  { %v233_v55 = vmul.f32 %v128_v54, %v128_v54  ;;  %v285_v56 = vpop.eup %284 }
  0x68   :  { %v287_v58 = vpop.eup %286  ;;  %v229_v59 = vxor.u32 2147483648, %v285_v56 }
  0x69   :  { %v235_v57 = vmul.f32 2.0, %v233_v55  ;;  %v226_v61 = vxor.u32 2147483648, %v287_v58 }
  0x6a   :  { %v230_v24 = vsel %vm228_vm6, %v229_v59, %v287_v58 }
  0x6b   :  { %v237_v60 = vadd.f32 %v235_v57, %v366_v0  ;;  %v227_v2 = vsel %vm225_vm7, %v285_v56, %v226_v61 }
  0x6c   :  { %v231_v62 = vsel %vm224_vm8, %v227_v2, %v230_v24 }
  0x6d   :  { %239 = vst [vmem:[#allocation5] sm:$0xff] %v237_v60  ;;  %v232_v63 = vsel %vm221_vm9, nan, %v231_v62 }
  0x6e   :  { %v234_v5 = vmul.f32 %v232_v63, %v232_v63 }
  0x70   :  { %v236_v7 = vmul.f32 2.0, %v234_v5 }
  0x72   :  { %v238_v8 = vadd.f32 %v236_v7, %v368_v1 }
  0x74   :  { %240 = vst [vmem:[#allocation5 + $0x8] sm:$0xff] %v238_v8 }
  0x75   :  { %321 = shalt.err (!%p318_p12)
}
  0x76   :  { %s322_s22 = scalar_lea.hbm %s457_s1, 256 }
  0x77   :  { %p323_p13 = scmp.ne.s32.totalorder %s457_s1, %s322_s22  ;;  %p326_p0 = scmp.lt.u32.totalorder %s322_s22, %s457_s1 }
  0x79   :  { %p328_p1 = pnand %p326_p0, %p323_p13 }
  0x7b   :  { %331 = shalt.err (!%p328_p1)
}
  0x7c   :  { %250 = dma.vmem_to_hbm [thread:$0]  %s248_s18, 256, %s457_s1, [#allocation4]  }
  0x7d   :  { %334 = dma.done.wait [#allocation4], 256  }
  0x7e   :  { %335 = vsyncadd [#allocation4], 4294967040 }
  0x7f   :  { %254 = vsyncpa [#allocation3], 1 }
  0x80   :  { %255 = vsyncpa [#allocation4], 1 }

</bundles_post_ra>
